<compile_context>
chip_gen: v7x
topology: tpu7x:2x2x1
jax: 0.10.0
libtpu: 0.0.40
codegen_flags: <defaults>
</compile_context>

<pallas_src>
import functools

import jax
import jax.numpy as jnp
from jax import lax
from jax.experimental import pallas as pl
from jax.experimental.pallas import tpu as pltpu


def _round_up(n, m):
    return ((n + m - 1) // m) * m


def decoder_rnn_kernel(tok_ref, h0_ref, embp_ref, whh_ref, wlin_ref, blin_ref,
                       out_ref, hfin_ref, *, v_valid):
    """Fused embedding + tanh-RNN recurrence + Linear + LogSoftmax.

    Shapes (already padded lane-dense by the wrapper / param prep):
      tok_ref  : (S*Bp, 1) int32   time-major token ids (padded batch rows use 0)
      h0_ref   : (Bp, Hp)          incoming hidden state
      embp_ref : (Vp, Hp)          embedding @ W_ih^T + (b_ih + b_hh), zero-padded
      whh_ref  : (Hp, Hp)          W_hh^T
      wlin_ref : (Hp, Vp)          W_lin^T
      blin_ref : (1, Vp)
      out_ref  : (Bp, Vp)          log_softmax(linear(h_1)) == output[:, 0, :]
      hfin_ref : (Bp, Hp)          final hidden state (written exactly once)
    """
    Bp, Hp = h0_ref.shape
    SB = tok_ref.shape[0]
    S = SB // Bp
    Vmp = embp_ref.shape[0]
    Vp = wlin_ref.shape[1]

    # ---- Fused embedding lookup + input projection (+ RNN bias): one MXU matmul.
    # one_hot(tokens) @ (embedding @ W_ih^T + b) selects the projected row per token.
    # TODO(synk): for very large vocabularies switch this to a dynamic-slice /
    # DMA row gather instead of the one-hot matmul.
    tok = tok_ref[...]                                             # (S*Bp, 1) int32
    vid = lax.broadcasted_iota(jnp.int32, (SB, Vmp), 1)
    onehot = (vid == tok).astype(jnp.float32)                      # (S*Bp, Vmp)
    xw = jnp.dot(onehot, embp_ref[...],
                 preferred_element_type=jnp.float32)               # (S*Bp, Hp)

    whh = whh_ref[...]
    # TODO(synk): on v6e/v7x cast MXU operands (onehot/embp/whh/wlin, h) to bfloat16
    # with f32 accumulation for more MXU throughput; kept f32 for tight tolerances.
    # TODO(synk): for much larger S, make W_hh weight-stationary on the MXU
    # (pltpu.matmul_push_rhs / matmul_acc_lhs / matmul_pop) and switch the unrolled
    # Python loop to lax.fori_loop(..., unroll=k) to bound vreg live ranges.

    # ---- Recurrence: hidden carried in vregs; fully unrolled (S static, small).
    h = jnp.tanh(xw[:Bp, :]
                 + jnp.dot(h0_ref[...], whh, preferred_element_type=jnp.float32))
    h1 = h                                                         # hidden after t = 0
    for t in range(1, S):
        h = jnp.tanh(xw[t * Bp:(t + 1) * Bp, :]
                     + jnp.dot(h, whh, preferred_element_type=jnp.float32))
    hfin_ref[...] = h                                              # single store

    # ---- Linear + LogSoftmax on the t=0 hidden (== output[:, 0, :]).
    logits = (jnp.dot(h1, wlin_ref[...], preferred_element_type=jnp.float32)
              + blin_ref[...])
    col = lax.broadcasted_iota(jnp.int32, (Bp, Vp), 1)
    logits = jnp.where(col < v_valid, logits, -jnp.inf)            # mask vocab padding
    m = jnp.max(logits, axis=-1, keepdims=True)
    lse = jnp.log(jnp.sum(jnp.exp(logits - m), axis=-1, keepdims=True)) + m
    out_ref[...] = (logits - lse).astype(out_ref.dtype)


def init_decoder_params(key, emb_size, decoder_hidden_size, output_size):
    """Deterministic synthetic parameters matching the PyTorch module's shapes."""
    ks = jax.random.split(key, 7)
    k_rnn = 1.0 / jnp.sqrt(decoder_hidden_size)
    k_lin = 1.0 / jnp.sqrt(decoder_hidden_size)
    return {
        # nn.Embedding(output_size, emb_size)
        "embedding": jax.random.normal(ks[0], (output_size, emb_size), jnp.float32),
        # nn.RNN(emb_size, decoder_hidden_size): W_ih (H,E), W_hh (H,H), b_ih, b_hh
        "w_ih": jax.random.uniform(ks[1], (decoder_hidden_size, emb_size),
                                   jnp.float32, -k_rnn, k_rnn),
        "w_hh": jax.random.uniform(ks[2], (decoder_hidden_size, decoder_hidden_size),
                                   jnp.float32, -k_rnn, k_rnn),
        "b_ih": jax.random.uniform(ks[3], (decoder_hidden_size,),
                                   jnp.float32, -k_rnn, k_rnn),
        "b_hh": jax.random.uniform(ks[4], (decoder_hidden_size,),
                                   jnp.float32, -k_rnn, k_rnn),
        # nn.Linear(decoder_hidden_size, output_size)
        "w_lin": jax.random.uniform(ks[5], (output_size, decoder_hidden_size),
                                    jnp.float32, -k_lin, k_lin),
        "b_lin": jax.random.uniform(ks[6], (output_size,),
                                    jnp.float32, -k_lin, k_lin),
    }


def prep_decoder_params(params):
    """One-time repack of the PyTorch-layout params into kernel layout.

    Hoists all transposes / zero-padding / the (embedding @ W_ih^T + b) projection
    out of the per-call path. Call once, reuse for every decode step.
    """
    H = params["w_hh"].shape[0]
    V, E = params["embedding"].shape
    Hp = _round_up(H, 128)
    Vp = _round_up(V, 128)
    f32 = jnp.float32

    # Fused lookup table: the RNN input projection of token v (dropout is identity
    # in eval mode) is exactly row v of this table.
    emb_proj = (params["embedding"].astype(f32) @ params["w_ih"].T.astype(f32)
                + (params["b_ih"] + params["b_hh"]).astype(f32)[None, :])    # (V, H)

    embp = jnp.zeros((Vp, Hp), f32).at[:V, :H].set(emb_proj)
    whh_t = jnp.zeros((Hp, Hp), f32).at[:H, :H].set(params["w_hh"].T.astype(f32))
    wlin_t = jnp.zeros((Hp, Vp), f32).at[:H, :V].set(params["w_lin"].T.astype(f32))
    b_lin = jnp.zeros((1, Vp), f32).at[0, :V].set(params["b_lin"].astype(f32))

    return {"embp": embp, "whh_t": whh_t, "wlin_t": wlin_t, "b_lin": b_lin,
            "H": H, "Hp": Hp, "V": V, "Vp": Vp, "E": E}


def decoder_forward(tokens, hidden, prepped):
    """tokens: (B, S) int; hidden: (1, B, H) float32; prepped from prep_decoder_params."""
    B, S = tokens.shape
    H, Hp, V, Vp = prepped["H"], prepped["Hp"], prepped["V"], prepped["Vp"]
    Bp = _round_up(max(B, 8), 8)
    f32 = jnp.float32

    # Per-call glue is only these two tiny pads; all weight repacking is pre-done.
    tok = jnp.zeros((Bp, S), jnp.int32).at[:B].set(tokens.astype(jnp.int32))
    tok = tok.T.reshape(S * Bp, 1)                                  # time-major
    h0 = jnp.zeros((Bp, Hp), f32).at[:B, :H].set(hidden[0].astype(f32))

    kernel = functools.partial(decoder_rnn_kernel, v_valid=V)

    out_p, h_p = pl.pallas_call(
        kernel,
        out_shape=(jax.ShapeDtypeStruct((Bp, Vp), f32),
                   jax.ShapeDtypeStruct((Bp, Hp), f32)),
        in_specs=[pl.BlockSpec(memory_space=pltpu.MemorySpace.VMEM)] * 6,
        out_specs=(pl.BlockSpec(memory_space=pltpu.MemorySpace.VMEM),
                   pl.BlockSpec(memory_space=pltpu.MemorySpace.VMEM)),
    )(tok, h0, prepped["embp"], prepped["whh_t"], prepped["wlin_t"], prepped["b_lin"])

    out = out_p[:B, :V]                                             # (B, V)
    h_fin = h_p[:B, :H]                                             # (B, H)
    return out, h_fin[None]                                         # ((B, V), (1, B, H))


def decoder_forward_ref(tokens, hidden, params):
    """Pure-JAX reference for correctness checking."""
    emb = jnp.take(params["embedding"], tokens, axis=0)             # (B, S, E)
    h = hidden[0]
    b = params["b_ih"] + params["b_hh"]
    outs0 = None
    for t in range(tokens.shape[1]):
        h = jnp.tanh(emb[:, t] @ params["w_ih"].T + h @ params["w_hh"].T + b)
        if t == 0:
            logits = h @ params["w_lin"].T + params["b_lin"]
            outs0 = jax.nn.log_softmax(logits, axis=-1)
    return outs0, h[None]


if __name__ == "__main__":
    # Small shapes consistent with the module's forward.
    B, S = 2, 8            # batch, seq_len
    E = 32                 # emb_size
    H = 32                 # decoder_hidden_size (encoder_hidden_size unused in forward)
    V = 48                 # output_size (vocab)

    key = jax.random.PRNGKey(0)
    k_par, k_tok, k_hid = jax.random.split(key, 3)

    params = init_decoder_params(k_par, E, H, V)
    tokens = jax.random.randint(k_tok, (B, S), 0, V, dtype=jnp.int32)
    hidden = jax.random.normal(k_hid, (1, B, H), jnp.float32)

    prepped = prep_decoder_params(params)                           # one-time repack

    out, h_out = decoder_forward(tokens, hidden, prepped)
    out = jax.block_until_ready(out)
    h_out = jax.block_until_ready(h_out)

    out_ref, h_ref = decoder_forward_ref(tokens, hidden, params)
    assert out.shape == (B, V) and h_out.shape == (1, B, H)
    assert jnp.allclose(out, out_ref, atol=1e-4, rtol=1e-4)
    assert jnp.allclose(h_out, h_ref, atol=1e-4, rtol=1e-4)

    print("KERNEL_OK")
</pallas_src>

<mosaic_0001>
module attributes {stable_mosaic.version = 11 : i64} {
  func.func @decoder_rnn_kernel(%arg0: memref<64x1xi32, #tpu.memory_space<vmem>>, %arg1: memref<8x128xf32, #tpu.memory_space<vmem>>, %arg2: memref<128x128xf32, #tpu.memory_space<vmem>>, %arg3: memref<128x128xf32, #tpu.memory_space<vmem>>, %arg4: memref<128x128xf32, #tpu.memory_space<vmem>>, %arg5: memref<1x128xf32, #tpu.memory_space<vmem>>, %arg6: memref<8x128xf32, #tpu.memory_space<vmem>>, %arg7: memref<8x128xf32, #tpu.memory_space<vmem>>) attributes {dimension_semantics = [], scalar_prefetch = 0 : i64, scratch_operands = 0 : i64, tpu.core_type = #tpu.core_type<tc>} {
    %c0 = arith.constant 0 : index
    %c0_0 = arith.constant 0 : index
    %0 = vector.load %arg0[%c0, %c0_0] : memref<64x1xi32, #tpu.memory_space<vmem>>, vector<64x1xi32>
    %1 = tpu.iota {dimensions = array<i32: 1>} : vector<64x128xi32>
    %2 = vector.broadcast %0 : vector<64x1xi32> to vector<64x128xi32>
    %3 = arith.cmpi eq, %1, %2 : vector<64x128xi32>
    %4 = arith.extui %3 : vector<64x128xi1> to vector<64x128xi32>
    %5 = arith.sitofp %4 : vector<64x128xi32> to vector<64x128xf32>
    %c0_1 = arith.constant 0 : index
    %c0_2 = arith.constant 0 : index
    %6 = vector.load %arg2[%c0_1, %c0_2] : memref<128x128xf32, #tpu.memory_space<vmem>>, vector<128x128xf32>
    %cst = arith.constant dense<0.000000e+00> : vector<64x128xf32>
    %7 = tpu.matmul %5, %6, %cst {dimension_numbers = #tpu.dot_dimension_numbers<[1], [0], [0], [1], [0, 0, 1, 1], [], []>} : vector<64x128xf32>, vector<128x128xf32>, vector<64x128xf32> -> vector<64x128xf32>
    %c0_3 = arith.constant 0 : index
    %c0_4 = arith.constant 0 : index
    %8 = vector.load %arg3[%c0_3, %c0_4] : memref<128x128xf32, #tpu.memory_space<vmem>>, vector<128x128xf32>
    %9 = vector.extract_strided_slice %7 {offsets = [0, 0], sizes = [8, 128], strides = [1, 1]} : vector<64x128xf32> to vector<8x128xf32>
    %c0_5 = arith.constant 0 : index
    %c0_6 = arith.constant 0 : index
    %10 = vector.load %arg1[%c0_5, %c0_6] : memref<8x128xf32, #tpu.memory_space<vmem>>, vector<8x128xf32>
    %cst_7 = arith.constant dense<0.000000e+00> : vector<8x128xf32>
    %11 = tpu.matmul %10, %8, %cst_7 {dimension_numbers = #tpu.dot_dimension_numbers<[1], [0], [0], [1], [0, 0, 1, 1], [], []>} : vector<8x128xf32>, vector<128x128xf32>, vector<8x128xf32> -> vector<8x128xf32>
    %12 = arith.addf %9, %11 : vector<8x128xf32>
    %13 = math.tanh %12 : vector<8x128xf32>
    %14 = vector.extract_strided_slice %7 {offsets = [8, 0], sizes = [8, 128], strides = [1, 1]} : vector<64x128xf32> to vector<8x128xf32>
    %cst_8 = arith.constant dense<0.000000e+00> : vector<8x128xf32>
    %15 = tpu.matmul %13, %8, %cst_8 {dimension_numbers = #tpu.dot_dimension_numbers<[1], [0], [0], [1], [0, 0, 1, 1], [], []>} : vector<8x128xf32>, vector<128x128xf32>, vector<8x128xf32> -> vector<8x128xf32>
    %16 = arith.addf %14, %15 : vector<8x128xf32>
    %17 = math.tanh %16 : vector<8x128xf32>
    %18 = vector.extract_strided_slice %7 {offsets = [16, 0], sizes = [8, 128], strides = [1, 1]} : vector<64x128xf32> to vector<8x128xf32>
    %cst_9 = arith.constant dense<0.000000e+00> : vector<8x128xf32>
    %19 = tpu.matmul %17, %8, %cst_9 {dimension_numbers = #tpu.dot_dimension_numbers<[1], [0], [0], [1], [0, 0, 1, 1], [], []>} : vector<8x128xf32>, vector<128x128xf32>, vector<8x128xf32> -> vector<8x128xf32>
    %20 = arith.addf %18, %19 : vector<8x128xf32>
    %21 = math.tanh %20 : vector<8x128xf32>
    %22 = vector.extract_strided_slice %7 {offsets = [24, 0], sizes = [8, 128], strides = [1, 1]} : vector<64x128xf32> to vector<8x128xf32>
    %cst_10 = arith.constant dense<0.000000e+00> : vector<8x128xf32>
    %23 = tpu.matmul %21, %8, %cst_10 {dimension_numbers = #tpu.dot_dimension_numbers<[1], [0], [0], [1], [0, 0, 1, 1], [], []>} : vector<8x128xf32>, vector<128x128xf32>, vector<8x128xf32> -> vector<8x128xf32>
    %24 = arith.addf %22, %23 : vector<8x128xf32>
    %25 = math.tanh %24 : vector<8x128xf32>
    %26 = vector.extract_strided_slice %7 {offsets = [32, 0], sizes = [8, 128], strides = [1, 1]} : vector<64x128xf32> to vector<8x128xf32>
    %cst_11 = arith.constant dense<0.000000e+00> : vector<8x128xf32>
    %27 = tpu.matmul %25, %8, %cst_11 {dimension_numbers = #tpu.dot_dimension_numbers<[1], [0], [0], [1], [0, 0, 1, 1], [], []>} : vector<8x128xf32>, vector<128x128xf32>, vector<8x128xf32> -> vector<8x128xf32>
    %28 = arith.addf %26, %27 : vector<8x128xf32>
    %29 = math.tanh %28 : vector<8x128xf32>
    %30 = vector.extract_strided_slice %7 {offsets = [40, 0], sizes = [8, 128], strides = [1, 1]} : vector<64x128xf32> to vector<8x128xf32>
    %cst_12 = arith.constant dense<0.000000e+00> : vector<8x128xf32>
    %31 = tpu.matmul %29, %8, %cst_12 {dimension_numbers = #tpu.dot_dimension_numbers<[1], [0], [0], [1], [0, 0, 1, 1], [], []>} : vector<8x128xf32>, vector<128x128xf32>, vector<8x128xf32> -> vector<8x128xf32>
    %32 = arith.addf %30, %31 : vector<8x128xf32>
    %33 = math.tanh %32 : vector<8x128xf32>
    %34 = vector.extract_strided_slice %7 {offsets = [48, 0], sizes = [8, 128], strides = [1, 1]} : vector<64x128xf32> to vector<8x128xf32>
    %cst_13 = arith.constant dense<0.000000e+00> : vector<8x128xf32>
    %35 = tpu.matmul %33, %8, %cst_13 {dimension_numbers = #tpu.dot_dimension_numbers<[1], [0], [0], [1], [0, 0, 1, 1], [], []>} : vector<8x128xf32>, vector<128x128xf32>, vector<8x128xf32> -> vector<8x128xf32>
    %36 = arith.addf %34, %35 : vector<8x128xf32>
    %37 = math.tanh %36 : vector<8x128xf32>
    %38 = vector.extract_strided_slice %7 {offsets = [56, 0], sizes = [8, 128], strides = [1, 1]} : vector<64x128xf32> to vector<8x128xf32>
    %cst_14 = arith.constant dense<0.000000e+00> : vector<8x128xf32>
    %39 = tpu.matmul %37, %8, %cst_14 {dimension_numbers = #tpu.dot_dimension_numbers<[1], [0], [0], [1], [0, 0, 1, 1], [], []>} : vector<8x128xf32>, vector<128x128xf32>, vector<8x128xf32> -> vector<8x128xf32>
    %40 = arith.addf %38, %39 : vector<8x128xf32>
    %41 = math.tanh %40 : vector<8x128xf32>
    %c0_15 = arith.constant 0 : index
    %c0_16 = arith.constant 0 : index
    %42 = vector.load %arg7[%c0_15, %c0_16] : memref<8x128xf32, #tpu.memory_space<vmem>>, vector<8x128xf32>
    tpu.vector_store %arg7[%c0_15, %c0_16], %41 {strides = array<i32>} : memref<8x128xf32, #tpu.memory_space<vmem>>, vector<8x128xf32>,
    %c0_17 = arith.constant 0 : index
    %c0_18 = arith.constant 0 : index
    %43 = vector.load %arg4[%c0_17, %c0_18] : memref<128x128xf32, #tpu.memory_space<vmem>>, vector<128x128xf32>
    %cst_19 = arith.constant dense<0.000000e+00> : vector<8x128xf32>
    %44 = tpu.matmul %13, %43, %cst_19 {dimension_numbers = #tpu.dot_dimension_numbers<[1], [0], [0], [1], [0, 0, 1, 1], [], []>} : vector<8x128xf32>, vector<128x128xf32>, vector<8x128xf32> -> vector<8x128xf32>
    %c0_20 = arith.constant 0 : index
    %c0_21 = arith.constant 0 : index
    %45 = vector.load %arg5[%c0_20, %c0_21] : memref<1x128xf32, #tpu.memory_space<vmem>>, vector<1x128xf32>
    %46 = vector.broadcast %45 : vector<1x128xf32> to vector<8x128xf32>
    %47 = arith.addf %44, %46 : vector<8x128xf32>
    %48 = tpu.iota {dimensions = array<i32: 1>} : vector<8x128xi32>
    %c48_i32 = arith.constant 48 : i32
    %49 = vector.broadcast %c48_i32 : i32 to vector<8x128xi32>
    %50 = arith.cmpi slt, %48, %49 : vector<8x128xi32>
    %cst_22 = arith.constant 0xFF800000 : f32
    %51 = vector.broadcast %cst_22 : f32 to vector<8x128xf32>
    %52 = arith.select %50, %47, %51 : vector<8x128xi1>, vector<8x128xf32>
    %cst_23 = arith.constant dense<0xFF800000> : vector<8xf32>
    %53 = vector.multi_reduction <maximumf>, %52, %cst_23 [1] : vector<8x128xf32> to vector<8xf32>
    %54 = vector.shape_cast %53 : vector<8xf32> to vector<8x1xf32>
    %55 = vector.broadcast %54 : vector<8x1xf32> to vector<8x128xf32>
    %56 = arith.subf %52, %55 : vector<8x128xf32>
    %57 = math.exp %56 : vector<8x128xf32>
    %cst_24 = arith.constant dense<0.000000e+00> : vector<8xf32>
    %58 = vector.multi_reduction <add>, %57, %cst_24 [1] : vector<8x128xf32> to vector<8xf32>
    %59 = vector.shape_cast %58 : vector<8xf32> to vector<8x1xf32>
    %60 = math.log %59 : vector<8x1xf32>
    %61 = arith.addf %60, %54 : vector<8x1xf32>
    %62 = vector.broadcast %61 : vector<8x1xf32> to vector<8x128xf32>
    %63 = arith.subf %52, %62 : vector<8x128xf32>
    %c0_25 = arith.constant 0 : index
    %c0_26 = arith.constant 0 : index
    %64 = vector.load %arg6[%c0_25, %c0_26] : memref<8x128xf32, #tpu.memory_space<vmem>>, vector<8x128xf32>
    tpu.vector_store %arg6[%c0_25, %c0_26], %63 {strides = array<i32>} : memref<8x128xf32, #tpu.memory_space<vmem>>, vector<8x128xf32>,
    return
  }
}

</mosaic_0001>

<bundles_post_ra>
// kernel: tpu_custom_call.1
= control target key start
LH: loop header
LB: loop body
LE: loop exit
PB: predicated region body
PF: predicated region fallthrough
CT: control target
= control target key end

     0   :  { %13 = vsyncpa [#allocation3], 0  ;;  %s2289_s0 = inlined_call_operand.vmem [shape: s32[64,1], index: 0, kind: input, shape index: {}]   ;;  %s2290_s1 = inlined_call_operand.vmem [shape: f32[8,128], index: 1, kind: input, shape index: {}]   ;;  %s2291_s2 = inlined_call_operand.hbm [shape: f32[128,128], index: 2, kind: input, shape index: {}]   ;;  %s2292_s3 = inlined_call_operand.hbm [shape: f32[128,128], index: 3, kind: input, shape index: {}]   ;;  %s2293_s4 = inlined_call_operand.hbm [shape: f32[128,128], index: 4, kind: input, shape index: {}]   ;;  %s2294_s5 = inlined_call_operand.vmem [shape: f32[1,128], index: 5, kind: input, shape index: {}]   ;;  %s2295_s6 = inlined_call_operand.hbm [shape: f32[8,128], index: 6, kind: output, shape index: {0}]   ;;  %s2296_s7 = inlined_call_operand.hbm [shape: f32[8,128], index: 7, kind: output, shape index: {1}]  }
   0x1   :  { %14 = vsyncpa [#allocation6], 0 }
   0x2   :  { %15 = vsyncpa [#allocation4], 0 }
   0x3   :  { %16 = vsyncpa [#allocation10], 0  ;;  %s1931_s24 = smov [#allocation5]   ;;  %s1932_s26 = smov [#allocation2]  }
   0x4   :  { %s38_s25 = sshll.u32 %s1931_s24, 4  ;;  %s26_s27 = sshll.u32 %s1932_s26, 4  ;;  %s39_s25 = int_to_ptr.vmem [resolvable:$true] %s38_s25  ;;  %s1983_s27 = int_to_ptr.vmem [resolvable:$true] %s26_s27 }
   0x5   :  { %s1813_s30 = scalar_lea.hbm %s2292_s3, 2048 }
   0x6   :  { %p1814_p0 = scmp.ne.s32.totalorder %s2292_s3, %s1813_s30  ;;  %p1817_p1 = scmp.lt.u32.totalorder %s1813_s30, %s2292_s3 }
   0x8   :  { %p1819_p2 = pnand %p1817_p1, %p1814_p0 }
   0xa   :  { %1822 = shalt.err (!%p1819_p2)
}
   0xb   :  { %s1823_s12 = scalar_lea.vmem %s39_s25, 2048  ;;  %p1828_p4 = scmp.lt.s32.totalorder %s39_s25, %s39_s25 }
   0xc   :  { %p1824_p3 = scmp.ne.s32.totalorder %s39_s25, %s1823_s12  ;;  %p1829_p5 = scmp.lt.s32.totalorder %s1823_s12, %s1823_s12 }
   0xe   :  { %p1830_p6 = por %p1829_p5, %p1828_p4 }
  0x10   :  { %p1831_p7 = pnand %p1830_p6, %p1824_p3 }
  0x12   :  { %1834 = shalt.err (!%p1831_p7)
}
  0x13   :  { %s1933_s13 = smov 128   ;;  %s1934_s14 = smov 8  }
  0x14   :  { %44 = dma.hbm_to_vmem [thread:$0]  %s2292_s3, 2048, %s39_s25, [#allocation6], %s1933_s13, %s1933_s13, %s1934_s14  }
  0x15   :  { %s1835_s19 = scalar_lea.hbm %s2291_s2, 2048 }
  0x16   :  { %p1836_p8 = scmp.ne.s32.totalorder %s2291_s2, %s1835_s19  ;;  %p1839_p9 = scmp.lt.u32.totalorder %s1835_s19, %s2291_s2 }
  0x18   :  { %p1841_p10 = pnand %p1839_p9, %p1836_p8 }
  0x1a   :  { %1844 = shalt.err (!%p1841_p10)
}
  0x1b   :  { %s1845_s24 = scalar_lea.vmem %s1983_s27, 2048  ;;  %p1850_p12 = scmp.lt.s32.totalorder %s1983_s27, %s1983_s27 }
  0x1c   :  { %p1846_p11 = scmp.ne.s32.totalorder %s1983_s27, %s1845_s24  ;;  %p1851_p13 = scmp.lt.s32.totalorder %s1845_s24, %s1845_s24 }
  0x1e   :  { %p1852_p0 = por %p1851_p13, %p1850_p12 }
  0x20   :  { %p1853_p1 = pnand %p1852_p0, %p1846_p11 }
  0x22   :  { %1856 = shalt.err (!%p1853_p1)
}
  0x23   :  { %32 = dma.hbm_to_vmem [thread:$0]  %s2291_s2, 2048, %s1983_s27, [#allocation3], %s1933_s13, %s1933_s13, %s1934_s14  }
  0x24   :  { %s1935_s26 = smov [#allocation7]   ;;  %s1857_s8 = scalar_lea.hbm %s2293_s4, 2048 }
  0x25   :  { %s50_s28 = sshll.u32 %s1935_s26, 4  ;;  %p1858_p2 = scmp.ne.s32.totalorder %s2293_s4, %s1857_s8  ;;  %s51_s28 = int_to_ptr.vmem [resolvable:$true] %s50_s28 }
  0x26   :  { %p1861_p3 = scmp.lt.u32.totalorder %s1857_s8, %s2293_s4 }
  0x28   :  { %p1863_p4 = pnand %p1861_p3, %p1858_p2 }
  0x2a   :  { %1866 = shalt.err (!%p1863_p4)
}
  0x2b   :  { %s1867_s15 = scalar_lea.vmem %s51_s28, 2048  ;;  %p1872_p6 = scmp.lt.s32.totalorder %s51_s28, %s51_s28 }
  0x2c   :  { %p1868_p5 = scmp.ne.s32.totalorder %s51_s28, %s1867_s15  ;;  %p1873_p7 = scmp.lt.s32.totalorder %s1867_s15, %s1867_s15 }
  0x2e   :  { %p1874_p8 = por %p1873_p7, %p1872_p6 }
  0x30   :  { %p1875_p9 = pnand %p1874_p8, %p1868_p5 }
  0x32   :  { %1878 = shalt.err (!%p1875_p9)
}
  0x33   :  { %56 = dma.hbm_to_vmem [thread:$0]  %s2293_s4, 2048, %s51_s28, [#allocation6], %s1933_s13, %s1933_s13, %s1934_s14  }
  0x34   :  { %1923 = dma.done.wait [#allocation3], 2048  }
  0x35   :  { %1924 = vsyncadd [#allocation3], 4294965248 }
  0x36   :  { %1925 = dma.done.wait [#allocation6], 4096  }
  0x37   :  { %1926 = vsyncadd [#allocation6], 4294963200  ;;  %v1936_v0 = vmov 0   ;;  %v1937_v1 = vmov 0.0|0.0   ;;  %v68_v2 = vld [vmem:[%s2289_s0] sm:$0xff]  ;;  %v70_v3 = vld [vmem:[%s2289_s0 + $0x10] sm:$0xff]  ;;  %v76_v60 = vlaneseq }
  0x38   :  { %1791 = vset.pattern.permute.xlu0 %v1936_v0  ;;  %1792 = vset.pattern.permute.xlu1 %v1936_v0  ;;  %v69_v4 = vld [vmem:[%s2289_s0 + $0x8] sm:$0xff]  ;;  %v71_v5 = vld [vmem:[%s2289_s0 + $0x18] sm:$0xff]  ;;  %v126_v6 = vld [vmem:[#allocation2] sm:$0xff]  ;;  %vm1938_vm0 = vmmov 0   ;;  %v1939_v25 = vmov 0.0   ;;  %v1940_v0 = vmov 1.0  }
  0x39   :  { %1563 = vmatprep.subr.bf16.mxu1 %v1937_v1  ;;  %79 = vperm.xlu0 %1791, %v68_v2   ;;  %v127_v7 = vld [vmem:[#allocation2 + $0x8] sm:$0xff]  ;;  %v247_v9 = vld [vmem:[#allocation5] sm:$0xff]  ;;  %v128_v11 = vld [vmem:[#allocation2 + $0x10] sm:$0xff]  ;;  %v2116_v61 = vand.u32 127, %v76_v60  ;;  %s1941_s8 = smov [#allocation9]  }
  0x3a   :  { %85 = vperm.xlu1 %1792, %v70_v3   ;;  %v1531_v8 = vpack.c.bf16 %v127_v7, %v126_v6  ;;  %v248_v10 = vld [vmem:[#allocation5 + $0x8] sm:$0xff]  ;;  %v129_v13 = vld [vmem:[#allocation2 + $0x18] sm:$0xff]  ;;  %v249_v14 = vld [vmem:[#allocation5 + $0x10] sm:$0xff]  ;;  %1248 = vmatprep.mubr.msk.f32.mxu1 %vm1938_vm0, %v1939_v25 }
  0x3b   :  { %v2048_v12 = vpack.c.bf16 %v248_v10, %v247_v9  ;;  %v250_v15 = vld [vmem:[#allocation5 + $0x18] sm:$0xff]  ;;  %v1535_v16 = vpack.c.bf16 %v129_v13, %v128_v11  ;;  %v130_v17 = vld [vmem:[#allocation2 + $0x20] sm:$0xff]  ;;  %v131_v18 = vld [vmem:[#allocation2 + $0x28] sm:$0xff]  ;;  %vm934_vm9 = vcmp.lt.s32.totalorder %v2116_v61, 48 }
  0x3c   :  { %v72_v19 = vld [vmem:[%s2289_s0 + $0x20] sm:$0xff]  ;;  %v73_v20 = vld [vmem:[%s2289_s0 + $0x28] sm:$0xff]  ;;  %1532 = vmatprep.subr.bf16.mxu0 %v1531_v8  ;;  %v2057_v21 = vpack.c.bf16 %v250_v15, %v249_v14  ;;  %v1539_v24 = vpack.c.bf16 %v131_v18, %v130_v17  ;;  %v132_v26 = vld [vmem:[#allocation2 + $0x30] sm:$0xff] }
  0x3d   :  { %82 = vperm.xlu0 %1791, %v69_v4   ;;  %1565 = vmatpush3.bf16.msra.mxu1 %v2048_v12  ;;  %v251_v22 = vld [vmem:[#allocation5 + $0x20] sm:$0xff]  ;;  %v252_v23 = vld [vmem:[#allocation5 + $0x28] sm:$0xff]  ;;  %v133_v27 = vld [vmem:[#allocation2 + $0x38] sm:$0xff] }
  0x3e   :  { %88 = vperm.xlu1 %1792, %v71_v5   ;;  %1534 = vmatpush3.bf16.msra.mxu0 %v1531_v8  ;;  %v74_v28 = vld [vmem:[%s2289_s0 + $0x30] sm:$0xff]  ;;  %v2066_v29 = vpack.c.bf16 %v252_v23, %v251_v22  ;;  %v254_v31 = vld [vmem:[#allocation5 + $0x38] sm:$0xff]  ;;  %v1543_v32 = vpack.c.bf16 %v133_v27, %v132_v26  ;;  %v134_v33 = vld [vmem:[#allocation2 + $0x40] sm:$0xff] }
  0x3f   :  { %1566 = vmatprep.subr.bf16.mxu1 %v1937_v1  ;;  %1536 = vmatprep.subr.bf16.mxu0 %v1535_v16  ;;  %v253_v30 = vld [vmem:[#allocation5 + $0x30] sm:$0xff]  ;;  %v135_v34 = vld [vmem:[#allocation2 + $0x48] sm:$0xff]  ;;  %v255_v36 = vld [vmem:[#allocation5 + $0x40] sm:$0xff] }
  0x40   :  { %v2070_v35 = vpack.c.bf16 %v254_v31, %v253_v30  ;;  %v256_v37 = vld [vmem:[#allocation5 + $0x48] sm:$0xff]  ;;  %v75_v38 = vld [vmem:[%s2289_s0 + $0x38] sm:$0xff]  ;;  %v1547_v39 = vpack.c.bf16 %v135_v34, %v134_v33  ;;  %v136_v40 = vld [vmem:[#allocation2 + $0x50] sm:$0xff] }
  0x41   :  { %91 = vperm.xlu0 %1791, %v72_v19   ;;  %1568 = vmatpush3.bf16.msra.mxu1 %v2057_v21  ;;  %v137_v41 = vld [vmem:[#allocation2 + $0x58] sm:$0xff]  ;;  %v2077_v42 = vpack.c.bf16 %v256_v37, %v255_v36  ;;  %v257_v43 = vld [vmem:[#allocation5 + $0x50] sm:$0xff]  ;;  %v138_v46 = vld [vmem:[#allocation2 + $0x60] sm:$0xff] }
  0x42   :  { %94 = vperm.xlu1 %1792, %v73_v20   ;;  %1538 = vmatpush3.bf16.msra.mxu0 %v1535_v16  ;;  %v258_v44 = vld [vmem:[#allocation5 + $0x58] sm:$0xff]  ;;  %v1551_v45 = vpack.c.bf16 %v137_v41, %v136_v40  ;;  %v139_v47 = vld [vmem:[#allocation2 + $0x68] sm:$0xff]  ;;  %v259_v49 = vld [vmem:[#allocation5 + $0x60] sm:$0xff] }
  0x43   :  { %1569 = vmatprep.subr.bf16.mxu1 %v1937_v1  ;;  %1540 = vmatprep.subr.bf16.mxu0 %v1539_v24  ;;  %v2081_v48 = vpack.c.bf16 %v258_v44, %v257_v43  ;;  %v260_v50 = vld [vmem:[#allocation5 + $0x68] sm:$0xff]  ;;  %v1555_v51 = vpack.c.bf16 %v139_v47, %v138_v46  ;;  %v140_v52 = vld [vmem:[#allocation2 + $0x70] sm:$0xff]  ;;  %v141_v53 = vld [vmem:[#allocation2 + $0x78] sm:$0xff] }
  0x44   :  { %v2085_v54 = vpack.c.bf16 %v260_v50, %v259_v49  ;;  %v261_v55 = vld [vmem:[#allocation5 + $0x70] sm:$0xff]  ;;  %v262_v56 = vld [vmem:[#allocation5 + $0x78] sm:$0xff]  ;;  %v1559_v57 = vpack.c.bf16 %v141_v53, %v140_v52  ;;  %v263_v59 = vld [vmem:[%s2290_s1] sm:$0xff] }
  0x45   :  { %97 = vperm.xlu0 %1791, %v74_v28   ;;  %1571 = vmatpush3.bf16.msra.mxu1 %v2066_v29  ;;  %v2089_v58 = vpack.c.bf16 %v262_v56, %v261_v55  ;;  %v842_v41 = vld [vmem:[#allocation7 + $0x8] sm:$0xff]  ;;  %v843_v43 = vld [vmem:[#allocation7 + $0x10] sm:$0xff]  ;;  %v844_v44 = vld [vmem:[#allocation7 + $0x18] sm:$0xff] }
  0x46   :  { %1542 = vmatpush3.bf16.msra.mxu0 %v1539_v24  ;;  %1572 = vmatprep.subr.bf16.mxu1 %v1937_v1  ;;  %v1759_v46 = vpack.c.bf16 %v844_v44, %v843_v43  ;;  %v845_v47 = vld [vmem:[#allocation7 + $0x20] sm:$0xff]  ;;  %v847_v50 = vld [vmem:[#allocation7 + $0x30] sm:$0xff]  ;;  %v852_v56 = vld [vmem:[#allocation7 + $0x58] sm:$0xff] }
  0x47   :  { %1544 = vmatprep.subr.bf16.mxu0 %v1543_v32  ;;  %100 = vperm.xlu1 %1792, %v75_v38   ;;  %v849_v53 = vld [vmem:[#allocation7 + $0x40] sm:$0xff] }
  0x49   :  { %1574 = vmatpush3.bf16.msra.mxu1 %v2070_v35 }
  0x4a   :  { %1546 = vmatpush3.bf16.msra.mxu0 %v1543_v32  ;;  %1575 = vmatprep.subr.bf16.mxu1 %v1937_v1 }
  0x4b   :  { %1548 = vmatprep.subr.bf16.mxu0 %v1547_v39 }
  0x4d   :  { %1577 = vmatpush3.bf16.msra.mxu1 %v2077_v42 }
  0x4e   :  { %1550 = vmatpush3.bf16.msra.mxu0 %v1547_v39  ;;  %1578 = vmatprep.subr.bf16.mxu1 %v1937_v1 }
  0x4f   :  { %1552 = vmatprep.subr.bf16.mxu0 %v1551_v45 }
  0x51   :  { %1580 = vmatpush3.bf16.msra.mxu1 %v2081_v48 }
  0x52   :  { %1554 = vmatpush3.bf16.msra.mxu0 %v1551_v45  ;;  %1581 = vmatprep.subr.bf16.mxu1 %v1937_v1 }
  0x53   :  { %1556 = vmatprep.subr.bf16.mxu0 %v1555_v51 }
  0x55   :  { %1583 = vmatpush3.bf16.msra.mxu1 %v2085_v54 }
  0x56   :  { %1558 = vmatpush3.bf16.msra.mxu0 %v1555_v51  ;;  %1584 = vmatprep.subr.bf16.mxu1 %v1937_v1  ;;  %v848_v51 = vld [vmem:[#allocation7 + $0x38] sm:$0xff] }
  0x57   :  { %1560 = vmatprep.subr.bf16.mxu0 %v1559_v57  ;;  %v1765_v52 = vpack.c.bf16 %v848_v51, %v847_v50 }
  0x59   :  { %1586 = vmatpush3.bf16.msra.mxu1 %v2089_v58 }
  0x5a   :  { %1562 = vmatpush3.bf16.msra.mxu0 %v1559_v57  ;;  %1611 = vmatprep.subr.bf16.mxu1 %v1937_v1 }
  0x5b   :  { %1587 = vmatprep.subr.bf16.mxu0 %v1937_v1 }
  0x5c   :  { %1249 = vmatmul.mubr.f32.vlgmr.msra.gmra.mrb[0].mxu1 %v263_v59  ;;  %v854_v59 = vld [vmem:[#allocation7 + $0x68] sm:$0xff] }
  0x5d   :  { %1613 = vmatpush3.bf16.msra.mxu1 %v2048_v12  ;;  %1318 = vmatprep.mubr.msk.f32.mxu1 %vm1938_vm0, %v1939_v25 }
  0x5e   :  { %1614 = vmatprep.subr.bf16.mxu1 %v1937_v1 }
  0x61   :  { %1616 = vmatpush3.bf16.msra.mxu1 %v2057_v21 }
  0x62   :  { %1617 = vmatprep.subr.bf16.mxu1 %v1937_v1 }
  0x65   :  { %1619 = vmatpush3.bf16.msra.mxu1 %v2066_v29 }
  0x66   :  { %1620 = vmatprep.subr.bf16.mxu1 %v1937_v1 }
  0x69   :  { %1622 = vmatpush3.bf16.msra.mxu1 %v2070_v35 }
  0x6a   :  { %1623 = vmatprep.subr.bf16.mxu1 %v1937_v1 }
  0x6d   :  { %1625 = vmatpush3.bf16.msra.mxu1 %v2077_v42 }
  0x6e   :  { %1626 = vmatprep.subr.bf16.mxu1 %v1937_v1 }
  0x71   :  { %1628 = vmatpush3.bf16.msra.mxu1 %v2081_v48 }
  0x72   :  { %1629 = vmatprep.subr.bf16.mxu1 %v1937_v1 }
  0x75   :  { %1631 = vmatpush3.bf16.msra.mxu1 %v2085_v54 }
  0x76   :  { %1632 = vmatprep.subr.bf16.mxu1 %v1937_v1 }
  0x79   :  { %1634 = vmatpush3.bf16.msra.mxu1 %v2089_v58 }
  0x7a   :  { %1659 = vmatprep.subr.bf16.mxu1 %v1937_v1 }
  0xb8   :  { %v80_v62 = vpop.permute.xlu0 %79 }
  0xb9   :  { %v86_v63 = vpop.permute.xlu1 %85  ;;  %vm102_vm1 = vcmp.eq.s32.totalorder %v2116_v61, %v80_v62  ;;  %v855_v62 = vld [vmem:[#allocation7 + $0x70] sm:$0xff] }
  0xba   :  { %1204 = vmatprep.mubr.msk.f32.mxu0 %vm102_vm1, %v1940_v0  ;;  %vm104_vm2 = vcmp.eq.s32.totalorder %v2116_v61, %v86_v63  ;;  %v856_v63 = vld [vmem:[#allocation7 + $0x78] sm:$0xff] }
  0xbc   :  { %v83_v2 = vpop.permute.xlu0 %82 }
  0xbd   :  { %v89_v3 = vpop.permute.xlu1 %88  ;;  %vm103_vm3 = vcmp.eq.s32.totalorder %v2116_v61, %v83_v2 }
  0xbe   :  { %1205 = vmatmul.mubr.msk.f32.vlgmr.msra.gmra.mrb[0].mxu0 %vm103_vm3, %v1940_v0  ;;  %vm105_vm4 = vcmp.eq.s32.totalorder %v2116_v61, %v89_v3 }
  0xbf   :  { %1207 = vmatprep.mubr.msk.f32.mxu0 %vm104_vm2, %v1940_v0  ;;  %1589 = vmatpush3.bf16.msra.mxu0 %v2048_v12 }
  0xc0   :  { %v92_v4 = vpop.permute.xlu0 %91  ;;  %1590 = vmatprep.subr.bf16.mxu0 %v1937_v1 }
  0xc1   :  { %v95_v5 = vpop.permute.xlu1 %94  ;;  %vm106_vm5 = vcmp.eq.s32.totalorder %v2116_v61, %v92_v4 }
  0xc2   :  { %1208 = vmatmul.mubr.msk.f32.gmra.mrb[2].mxu0 %vm105_vm4, %v1940_v0  ;;  %vm107_vm6 = vcmp.eq.s32.totalorder %v2116_v61, %v95_v5 }
  0xc3   :  { %1210 = vmatprep.mubr.msk.f32.mxu0 %vm106_vm5, %v1940_v0  ;;  %1592 = vmatpush3.bf16.msra.mxu0 %v2057_v21 }
  0xc4   :  { %v98_v6 = vpop.permute.xlu0 %97  ;;  %1593 = vmatprep.subr.bf16.mxu0 %v1937_v1 }
  0xc5   :  { %vm108_vm7 = vcmp.eq.s32.totalorder %v2116_v61, %v98_v6  ;;  %v994_v6 = vld [vmem:[%s2294_s5] ss:$0 sm:$0xff]  ;;  %s964_s5 = sshll.u32 %s1941_s8, 4  ;;  %s965_s5 = int_to_ptr.vmem [resolvable:$true] %s964_s5 }
  0xc6   :  { %1211 = vmatmul.mubr.msk.f32.gmra.mrb[4].mxu0 %vm107_vm6, %v1940_v0  ;;  %v101_v7 = vpop.permute.xlu1 %100  ;;  %s1879_s9 = scalar_lea.vmem %s965_s5, 128  ;;  %p1884_p11 = scmp.lt.s32.totalorder %s965_s5, %s965_s5 }
  0xc7   :  { %1213 = vmatprep.mubr.msk.f32.mxu0 %vm108_vm7, %v1940_v0  ;;  %1595 = vmatpush3.bf16.msra.mxu0 %v2066_v29  ;;  %vm109_vm8 = vcmp.eq.s32.totalorder %v2116_v61, %v101_v7  ;;  %p1880_p10 = scmp.ne.s32.totalorder %s965_s5, %s1879_s9  ;;  %p1885_p12 = scmp.lt.s32.totalorder %s1879_s9, %s1879_s9 }
  0xc8   :  { %1596 = vmatprep.subr.bf16.mxu0 %v1937_v1 }
  0xc9   :  { %p1886_p13 = por %p1885_p12, %p1884_p11 }
  0xca   :  { %1214 = vmatmul.mubr.msk.f32.gmra.mrb[6].mxu0 %vm109_vm8, %v1940_v0  ;;  %v1777_v0 = vpack.c.bf16 %v856_v63, %v855_v62 }
  0xcb   :  { %1598 = vmatpush3.bf16.msra.mxu0 %v2070_v35  ;;  %1283 = vmatprep.mubr.msk.f32.mxu0 %vm1938_vm0, %v1939_v25  ;;  %p1887_p0 = pnand %p1886_p13, %p1880_p10 }
  0xcc   :  { %1599 = vmatprep.subr.bf16.mxu0 %v1937_v1 }
  0xcf   :  { %1601 = vmatpush3.bf16.msra.mxu0 %v2077_v42 }
  0xd0   :  { %1602 = vmatprep.subr.bf16.mxu0 %v1937_v1 }
  0xd3   :  { %1604 = vmatpush3.bf16.msra.mxu0 %v2081_v48 }
  0xd4   :  { %1605 = vmatprep.subr.bf16.mxu0 %v1937_v1 }
  0xd7   :  { %1607 = vmatpush3.bf16.msra.mxu0 %v2085_v54 }
  0xd8   :  { %1608 = vmatprep.subr.bf16.mxu0 %v1937_v1 }
  0xdb   :  { %1610 = vmatpush3.bf16.msra.mxu0 %v2089_v58 }
  0xdc   :  { %1635 = vmatprep.subr.bf16.mxu0 %v1937_v1 }
 0x12f   :  { %v330_v8 = vpop.f32.mrb[0].mxu1 }
 0x130   :  { %v1250_v9 = vpop.f32.mrb[1].mxu1 }
 0x191   :  { %v1206_v10 = vpop.f32.mrb[0].mxu0 }
 0x192   :  { %v208_v11 = vpop.f32.mrb[1].mxu0 }
 0x193   :  { %v334_v13 = vadd.f32 %v330_v8, %v208_v11 }
 0x195   :  { %1793 = vtanh.f32 %v334_v13  ;;  %v2144_v14 = vpop.f32.mrb[2].mxu0 }
 0x196   :  { %v218_v15 = vpop.f32.mrb[3].mxu0 }
 0x199   :  { %v2146_v16 = vpop.f32.mrb[4].mxu0 }
 0x19a   :  { %v2148_v17 = vpop.f32.mrb[5].mxu0 }
 0x19d   :  { %v2150_v18 = vpop.f32.mrb[6].mxu0 }
 0x19e   :  { %v2152_v19 = vpop.f32.mrb[7].mxu0 }
 0x19f   :  { %v2154_v20 = vpop.eup %1793 }
 0x1a0   :  { %1284 = vmatmul.mubr.f32.vlgmr.msra.gmra.mrb[8].mxu0 %v2154_v20 }
 0x1a1   :  { %1637 = vmatpush3.bf16.msra.mxu0 %v2048_v12  ;;  %1353 = vmatprep.mubr.msk.f32.mxu0 %vm1938_vm0, %v1939_v25 }
 0x1a2   :  { %1638 = vmatprep.subr.bf16.mxu0 %v1937_v1 }
 0x1a5   :  { %1640 = vmatpush3.bf16.msra.mxu0 %v2057_v21 }
 0x1a6   :  { %1641 = vmatprep.subr.bf16.mxu0 %v1937_v1 }
 0x1a9   :  { %1643 = vmatpush3.bf16.msra.mxu0 %v2066_v29 }
 0x1aa   :  { %1644 = vmatprep.subr.bf16.mxu0 %v1937_v1 }
 0x1ad   :  { %1646 = vmatpush3.bf16.msra.mxu0 %v2070_v35 }
 0x1ae   :  { %1647 = vmatprep.subr.bf16.mxu0 %v1937_v1 }
 0x1b1   :  { %1649 = vmatpush3.bf16.msra.mxu0 %v2077_v42 }
 0x1b2   :  { %1650 = vmatprep.subr.bf16.mxu0 %v1937_v1 }
 0x1b5   :  { %1652 = vmatpush3.bf16.msra.mxu0 %v2081_v48 }
 0x1b6   :  { %1653 = vmatprep.subr.bf16.mxu0 %v1937_v1 }
 0x1b9   :  { %1655 = vmatpush3.bf16.msra.mxu0 %v2085_v54 }
 0x1ba   :  { %1656 = vmatprep.subr.bf16.mxu0 %v1937_v1 }
 0x1bd   :  { %1658 = vmatpush3.bf16.msra.mxu0 %v2089_v58 }
 0x1be   :  { %1683 = vmatprep.subr.bf16.mxu0 %v1937_v1 }
 0x273   :  { %v402_v22 = vpop.f32.mrb[8].mxu0 }
 0x274   :  { %v406_v23 = vadd.f32 %v1206_v10, %v402_v22  ;;  %v1285_v24 = vpop.f32.mrb[9].mxu0 }
 0x276   :  { %1795 = vtanh.f32 %v406_v23 }
 0x280   :  { %v1796_v26 = vpop.eup %1795 }
 0x281   :  { %1319 = vmatmul.mubr.f32.vlgmr.msra.gmra.mrb[2].mxu1 %v1796_v26 }
 0x282   :  { %1661 = vmatpush3.bf16.msra.mxu1 %v2048_v12  ;;  %1388 = vmatprep.mubr.msk.f32.mxu1 %vm1938_vm0, %v1939_v25 }
 0x283   :  { %1662 = vmatprep.subr.bf16.mxu1 %v1937_v1 }
 0x286   :  { %1664 = vmatpush3.bf16.msra.mxu1 %v2057_v21 }
 0x287   :  { %1665 = vmatprep.subr.bf16.mxu1 %v1937_v1 }
 0x28a   :  { %1667 = vmatpush3.bf16.msra.mxu1 %v2066_v29 }
 0x28b   :  { %1668 = vmatprep.subr.bf16.mxu1 %v1937_v1 }
 0x28e   :  { %1670 = vmatpush3.bf16.msra.mxu1 %v2070_v35 }
 0x28f   :  { %1671 = vmatprep.subr.bf16.mxu1 %v1937_v1 }
 0x292   :  { %1673 = vmatpush3.bf16.msra.mxu1 %v2077_v42 }
 0x293   :  { %1674 = vmatprep.subr.bf16.mxu1 %v1937_v1 }
 0x296   :  { %1676 = vmatpush3.bf16.msra.mxu1 %v2081_v48 }
 0x297   :  { %1677 = vmatprep.subr.bf16.mxu1 %v1937_v1 }
 0x29a   :  { %1679 = vmatpush3.bf16.msra.mxu1 %v2085_v54 }
 0x29b   :  { %1680 = vmatprep.subr.bf16.mxu1 %v1937_v1 }
 0x29e   :  { %1682 = vmatpush3.bf16.msra.mxu1 %v2089_v58 }
 0x29f   :  { %1707 = vmatprep.subr.bf16.mxu1 %v1937_v1 }
 0x354   :  { %v474_v27 = vpop.f32.mrb[2].mxu1 }
 0x355   :  { %v478_v28 = vadd.f32 %v474_v27, %v218_v15  ;;  %v1320_v30 = vpop.f32.mrb[3].mxu1 }
 0x357   :  { %1797 = vtanh.f32 %v478_v28 }
 0x361   :  { %v1798_v31 = vpop.eup %1797 }
 0x362   :  { %1354 = vmatmul.mubr.f32.vlgmr.msra.gmra.mrb[10].mxu0 %v1798_v31 }
 0x363   :  { %1685 = vmatpush3.bf16.msra.mxu0 %v2048_v12  ;;  %1423 = vmatprep.mubr.msk.f32.mxu0 %vm1938_vm0, %v1939_v25 }
 0x364   :  { %1686 = vmatprep.subr.bf16.mxu0 %v1937_v1 }
 0x367   :  { %1688 = vmatpush3.bf16.msra.mxu0 %v2057_v21 }
 0x368   :  { %1689 = vmatprep.subr.bf16.mxu0 %v1937_v1 }
 0x36b   :  { %1691 = vmatpush3.bf16.msra.mxu0 %v2066_v29 }
 0x36c   :  { %1692 = vmatprep.subr.bf16.mxu0 %v1937_v1 }
 0x36f   :  { %1694 = vmatpush3.bf16.msra.mxu0 %v2070_v35 }
 0x370   :  { %1695 = vmatprep.subr.bf16.mxu0 %v1937_v1 }
 0x373   :  { %1697 = vmatpush3.bf16.msra.mxu0 %v2077_v42 }
 0x374   :  { %1698 = vmatprep.subr.bf16.mxu0 %v1937_v1 }
 0x377   :  { %1700 = vmatpush3.bf16.msra.mxu0 %v2081_v48 }
 0x378   :  { %1701 = vmatprep.subr.bf16.mxu0 %v1937_v1 }
 0x37b   :  { %1703 = vmatpush3.bf16.msra.mxu0 %v2085_v54 }
 0x37c   :  { %1704 = vmatprep.subr.bf16.mxu0 %v1937_v1 }
 0x37f   :  { %1706 = vmatpush3.bf16.msra.mxu0 %v2089_v58 }
 0x380   :  { %1731 = vmatprep.subr.bf16.mxu0 %v1937_v1 }
 0x435   :  { %v546_v32 = vpop.f32.mrb[10].mxu0 }
 0x436   :  { %v550_v33 = vadd.f32 %v2144_v14, %v546_v32  ;;  %v1355_v34 = vpop.f32.mrb[11].mxu0 }
 0x438   :  { %1799 = vtanh.f32 %v550_v33 }
 0x442   :  { %v1800_v36 = vpop.eup %1799 }
 0x443   :  { %1389 = vmatmul.mubr.f32.vlgmr.msra.gmra.mrb[4].mxu1 %v1800_v36 }
 0x444   :  { %1709 = vmatpush3.bf16.msra.mxu1 %v2048_v12  ;;  %1458 = vmatprep.mubr.msk.f32.mxu1 %vm1938_vm0, %v1939_v25 }
 0x445   :  { %1710 = vmatprep.subr.bf16.mxu1 %v1937_v1 }
 0x448   :  { %1712 = vmatpush3.bf16.msra.mxu1 %v2057_v21 }
 0x449   :  { %1713 = vmatprep.subr.bf16.mxu1 %v1937_v1 }
 0x44c   :  { %1715 = vmatpush3.bf16.msra.mxu1 %v2066_v29 }
 0x44d   :  { %1716 = vmatprep.subr.bf16.mxu1 %v1937_v1 }
 0x450   :  { %1718 = vmatpush3.bf16.msra.mxu1 %v2070_v35 }
 0x451   :  { %1719 = vmatprep.subr.bf16.mxu1 %v1937_v1 }
 0x454   :  { %1721 = vmatpush3.bf16.msra.mxu1 %v2077_v42 }
 0x455   :  { %1722 = vmatprep.subr.bf16.mxu1 %v1937_v1 }
 0x458   :  { %1724 = vmatpush3.bf16.msra.mxu1 %v2081_v48 }
 0x459   :  { %1725 = vmatprep.subr.bf16.mxu1 %v1937_v1 }
 0x45c   :  { %1727 = vmatpush3.bf16.msra.mxu1 %v2085_v54 }
 0x45d   :  { %1728 = vmatprep.subr.bf16.mxu1 %v1937_v1 }
 0x460   :  { %1730 = vmatpush3.bf16.msra.mxu1 %v2089_v58 }
 0x461   :  { %1755 = vmatprep.subr.bf16.mxu1 %v1937_v1 }
 0x516   :  { %v618_v37 = vpop.f32.mrb[4].mxu1 }
 0x517   :  { %v622_v38 = vadd.f32 %v618_v37, %v2148_v17  ;;  %v1390_v39 = vpop.f32.mrb[5].mxu1 }
 0x519   :  { %1801 = vtanh.f32 %v622_v38 }
 0x523   :  { %v1802_v40 = vpop.eup %1801 }
 0x524   :  { %1424 = vmatmul.mubr.f32.vlgmr.msra.gmra.mrb[12].mxu0 %v1802_v40 }
 0x525   :  { %1733 = vmatpush3.bf16.msra.mxu0 %v2048_v12  ;;  %1493 = vmatprep.mubr.msk.f32.mxu0 %vm1938_vm0, %v1939_v25 }
 0x526   :  { %1734 = vmatprep.subr.bf16.mxu0 %v1937_v1 }
 0x529   :  { %1736 = vmatpush3.bf16.msra.mxu0 %v2057_v21 }
 0x52a   :  { %1737 = vmatprep.subr.bf16.mxu0 %v1937_v1 }
 0x52d   :  { %1739 = vmatpush3.bf16.msra.mxu0 %v2066_v29 }
 0x52e   :  { %1740 = vmatprep.subr.bf16.mxu0 %v1937_v1 }
 0x531   :  { %1742 = vmatpush3.bf16.msra.mxu0 %v2070_v35  ;;  %v841_v35 = vld [vmem:[#allocation7] sm:$0xff] }
 0x532   :  { %1743 = vmatprep.subr.bf16.mxu0 %v1937_v1 }
 0x535   :  { %1745 = vmatpush3.bf16.msra.mxu0 %v2077_v42  ;;  %v1756_v42 = vpack.c.bf16 %v842_v41, %v841_v35 }
 0x536   :  { %1746 = vmatprep.subr.bf16.mxu0 %v1937_v1 }
 0x539   :  { %1748 = vmatpush3.bf16.msra.mxu0 %v2081_v48  ;;  %v846_v48 = vld [vmem:[#allocation7 + $0x28] sm:$0xff] }
 0x53a   :  { %1749 = vmatprep.subr.bf16.mxu0 %v1937_v1  ;;  %v1762_v49 = vpack.c.bf16 %v846_v48, %v845_v47 }
 0x53d   :  { %1751 = vmatpush3.bf16.msra.mxu0 %v2085_v54  ;;  %v850_v54 = vld [vmem:[#allocation7 + $0x48] sm:$0xff] }
 0x53e   :  { %1752 = vmatprep.subr.bf16.mxu0 %v1937_v1  ;;  %v1768_v55 = vpack.c.bf16 %v850_v54, %v849_v53 }
 0x541   :  { %1754 = vmatpush3.bf16.msra.mxu0 %v2089_v58  ;;  %v853_v58 = vld [vmem:[#allocation7 + $0x60] sm:$0xff] }
 0x542   :  { %v1774_v60 = vpack.c.bf16 %v854_v59, %v853_v58 }
 0x5f7   :  { %v690_v12 = vpop.f32.mrb[12].mxu0 }
 0x5f8   :  { %v694_v21 = vadd.f32 %v2146_v16, %v690_v12  ;;  %v1425_v29 = vpop.f32.mrb[13].mxu0 }
 0x5fa   :  { %1803 = vtanh.f32 %v694_v21 }
 0x604   :  { %v1804_v45 = vpop.eup %1803 }
 0x605   :  { %1459 = vmatmul.mubr.f32.vlgmr.msra.gmra.mrb[6].mxu1 %v1804_v45 }
 0x606   :  { %1757 = vmatpush3.bf16.msra.mxu1 %v1756_v42  ;;  %1528 = vmatprep.mubr.msk.f32.mxu1 %vm1938_vm0, %v1939_v25  ;;  %v851_v25 = vld [vmem:[#allocation7 + $0x50] sm:$0xff] }
 0x607   :  { %1758 = vmatprep.subr.bf16.mxu1 %v1937_v1  ;;  %v1771_v57 = vpack.c.bf16 %v852_v56, %v851_v25 }
 0x60a   :  { %1760 = vmatpush3.bf16.msra.mxu1 %v1759_v46 }
 0x60b   :  { %1761 = vmatprep.subr.bf16.mxu1 %v1937_v1 }
 0x60e   :  { %1763 = vmatpush3.bf16.msra.mxu1 %v1762_v49 }
 0x60f   :  { %1764 = vmatprep.subr.bf16.mxu1 %v1937_v1 }
 0x612   :  { %1766 = vmatpush3.bf16.msra.mxu1 %v1765_v52 }
 0x613   :  { %1767 = vmatprep.subr.bf16.mxu1 %v1937_v1 }
 0x616   :  { %1769 = vmatpush3.bf16.msra.mxu1 %v1768_v55 }
 0x617   :  { %1770 = vmatprep.subr.bf16.mxu1 %v1937_v1 }
 0x61a   :  { %1772 = vmatpush3.bf16.msra.mxu1 %v1771_v57 }
 0x61b   :  { %1773 = vmatprep.subr.bf16.mxu1 %v1937_v1 }
 0x61e   :  { %1775 = vmatpush3.bf16.msra.mxu1 %v1774_v60 }
 0x61f   :  { %1776 = vmatprep.subr.bf16.mxu1 %v1937_v1 }
 0x622   :  { %1778 = vmatpush3.bf16.msra.mxu1 %v1777_v0 }
 0x625   :  { %1529 = vmatmul.mubr.f32.vlgmr.msra.gmra.mrb[8].mxu1 %v2154_v20 }
 0x6d8   :  { %v762_v2 = vpop.f32.mrb[6].mxu1 }
 0x6d9   :  { %v766_v3 = vadd.f32 %v762_v2, %v2152_v19  ;;  %v1460_v4 = vpop.f32.mrb[7].mxu1 }
 0x6db   :  { %1805 = vtanh.f32 %v766_v3 }
 0x6e5   :  { %v1806_v5 = vpop.eup %1805 }
 0x6e6   :  { %1494 = vmatmul.mubr.f32.vlgmr.msra.gmra.mrb[14].mxu0 %v1806_v5 }
 0x6f8   :  { %v930_v7 = vpop.f32.mrb[8].mxu1 }
 0x6f9   :  { %v931_v8 = vadd.f32 %v994_v6, %v930_v7  ;;  %v1530_v9 = vpop.f32.mrb[9].mxu1 }
 0x6fb   :  { %v935_v1 = vsel %vm934_vm9, %v931_v8, -inf }
 0x6fc   :  { %936 = vmax.xlane.f32.xlu0 %v935_v1 }
 0x789   :  { %v937_v10 = vpop.xlane.xlu0 %936 }
 0x78a   :  { %v938_v11 = vsub.f32 %v935_v1, %v937_v10 }
 0x78c   :  { %v939_v13 = vmul.f32 1.442695, %v938_v11 }
 0x78e   :  { %1807 = vpow2.f32 %v939_v13 }
 0x798   :  { %v1808_v14 = vpop.eup %1807 }
 0x799   :  { %941 = vadd.xlane.f32.xlu1 %v1808_v14 }
 0x7b9   :  { %v834_v15 = vpop.f32.mrb[14].mxu0 }
 0x7ba   :  { %v838_v16 = vadd.f32 %v2150_v18, %v834_v15  ;;  %v1495_v17 = vpop.f32.mrb[15].mxu0 }
 0x7bc   :  { %1809 = vtanh.f32 %v838_v16 }
 0x7c6   :  { %v1810_v19 = vpop.eup %1809 }
 0x7c7   :  { %840 = vst [vmem:[#allocation9] sm:$0xff] %v1810_v19 }
 0x7c8   :  { %1890 = shalt.err (!%p1887_p0)
}
 0x7c9   :  { %s1891_s12 = scalar_lea.hbm %s2296_s7, 128 }
 0x7ca   :  { %p1892_p1 = scmp.ne.s32.totalorder %s2296_s7, %s1891_s12  ;;  %p1895_p2 = scmp.lt.u32.totalorder %s1891_s12, %s2296_s7 }
 0x7cc   :  { %p1897_p3 = pnand %p1895_p2, %p1892_p1 }
 0x7ce   :  { %1900 = shalt.err (!%p1897_p3)
}
 0x7cf   :  { %967 = dma.vmem_to_hbm [thread:$0]  %s965_s5, 128, %s2296_s7, [#allocation10]  }
 0x7d0   :  { %s1942_s19 = smov [#allocation8]  }
 0x7d1   :  { %s954_s4 = sshll.u32 %s1942_s19, 4  ;;  %s955_s4 = int_to_ptr.vmem [resolvable:$true] %s954_s4 }
 0x7d2   :  { %s1901_s13 = scalar_lea.vmem %s955_s4, 128  ;;  %p1906_p5 = scmp.lt.s32.totalorder %s955_s4, %s955_s4 }
 0x7d3   :  { %p1902_p4 = scmp.ne.s32.totalorder %s955_s4, %s1901_s13  ;;  %p1907_p6 = scmp.lt.s32.totalorder %s1901_s13, %s1901_s13 }
 0x7d5   :  { %p1908_p7 = por %p1907_p6, %p1906_p5 }
 0x7d7   :  { %p1909_p8 = pnand %p1908_p7, %p1902_p4 }
 0x826   :  { %v942_v61 = vpop.xlane.xlu1 %941 }
 0x827   :  { %1811 = vlog2.f32 %v942_v61 }
 0x831   :  { %v1812_v18 = vpop.eup %1811 }
 0x832   :  { %v944_v20 = vmul.f32 0.6931472, %v1812_v18 }
 0x834   :  { %v945_v22 = vadd.f32 %v944_v20, %v937_v10 }
 0x836   :  { %v946_v23 = vsub.f32 %v935_v1, %v945_v22 }
 0x838   :  { %947 = vst [vmem:[#allocation8] sm:$0xff] %v946_v23 }
 0x839   :  { %1912 = shalt.err (!%p1909_p8)
}
 0x83a   :  { %s1913_s7 = scalar_lea.hbm %s2295_s6, 128 }
 0x83b   :  { %p1914_p9 = scmp.ne.s32.totalorder %s2295_s6, %s1913_s7  ;;  %p1917_p10 = scmp.lt.u32.totalorder %s1913_s7, %s2295_s6 }
 0x83d   :  { %p1919_p11 = pnand %p1917_p10, %p1914_p9 }
 0x83f   :  { %1922 = shalt.err (!%p1919_p11)
}
 0x840   :  { %957 = dma.vmem_to_hbm [thread:$0]  %s955_s4, 128, %s2295_s6, [#allocation4]  }
 0x841   :  { %1927 = dma.done.wait [#allocation4], 128  }
 0x842   :  { %1928 = vsyncadd [#allocation4], 4294967168 }
 0x843   :  { %1929 = dma.done.wait [#allocation10], 128  }
 0x844   :  { %1930 = vsyncadd [#allocation10], 4294967168 }
 0x845   :  { %974 = vsyncpa [#allocation3], 1 }
 0x846   :  { %975 = vsyncpa [#allocation6], 1 }
 0x847   :  { %976 = vsyncpa [#allocation4], 1 }
 0x848   :  { %977 = vsyncpa [#allocation10], 1 }

</bundles_post_ra>
